<compile_context>
chip_gen: v7x
topology: tpu7x:2x2x1
jax: 0.10.0
libtpu: 0.0.40
codegen_flags: <defaults>
</compile_context>

<pallas_src>
import jax
import jax.numpy as jnp
from jax.experimental import pallas as pl
from jax.experimental.pallas import tpu as pltpu


def _round_up(n, m):
    return (n + m - 1) // m * m


def _mixed_mlp_kernel(x_ref,                          # [BT, D]    f32
                      w1_ref, b1_ref,                 # [D, 2H] bf16, [1, 2H] f32
                      w2_ref, b2_ref,                 # [2H, OUTP] bf16, [1, OUTP] f32
                      o_ref):                         # [BT, OUTP] f32
    # Layer 1: one fused matmul covers both branches -> [BT, 2H], f32 accumulate.
    x = x_ref[...].astype(jnp.bfloat16)               # cast in-kernel (no extra XLA pass)
    h = jnp.dot(x, w1_ref[...], preferred_element_type=jnp.float32)
    h = jnp.maximum(h + b1_ref[...], 0.0)

    # Layer 2: one fused matmul [BT, 2H] @ [2H, OUTP].  The APFL alpha-mix is
    # already folded into w2 (rows scaled by alpha / 1-alpha) and b2.
    y = jnp.dot(h.astype(jnp.bfloat16), w2_ref[...],
                preferred_element_type=jnp.float32)
    o_ref[...] = y + b2_ref[...]


def mixed_model_forward(x_nchw, local_params, global_params, alpha):
    """x_nchw: [B, C, H, W] float32. Returns [B, OUT] float32."""
    B = x_nchw.shape[0]
    x = x_nchw.reshape(B, -1)                         # torch-style x.view(B, -1)
    D = x.shape[1]

    wl1, bl1, wl2, bl2 = local_params
    # .detach() semantics on the global branch.
    wg1, bg1, wg2, bg2 = [jax.lax.stop_gradient(p) for p in global_params]

    H = wl1.shape[1]
    OUT = wl2.shape[1]
    OUTP = _round_up(max(OUT, 128), 128)              # lane-dense output slab
    pad_out = OUTP - OUT
    a = jnp.float32(alpha)

    # Pack both branches (bf16 for the MXU, biases stay f32).  The alpha-mix is
    # folded into the layer-2 weights/bias (tiny, done once in the wrapper).
    # TODO(synk): if D grows large (e.g. 3x224x224), K-tile W1 with a trailing
    # "arbitrary" grid axis + f32 VMEM accumulator so it still fits v7x's 64 MiB.
    w1p = jnp.concatenate([wl1, wg1], axis=1).astype(jnp.bfloat16)      # [D, 2H]
    b1p = jnp.concatenate([bl1, bg1], axis=1).astype(jnp.float32)       # [1, 2H]
    w2p = jnp.concatenate(
        [jnp.pad(a * wl2, ((0, 0), (0, pad_out))),
         jnp.pad((1.0 - a) * wg2, ((0, 0), (0, pad_out)))],
        axis=0).astype(jnp.bfloat16)                                    # [2H, OUTP]
    b2p = jnp.pad(a * bl2 + (1.0 - a) * bg2,
                  ((0, 0), (0, pad_out))).astype(jnp.float32)           # [1, OUTP]

    # Batch padding + tiling (sublane-aligned; grid over batch for large B).
    BT = min(128, _round_up(B, 8))
    B_pad = _round_up(B, BT)
    xp = jnp.pad(x, ((0, B_pad - B), (0, 0))).astype(jnp.float32)       # [B_pad, D] f32

    const = lambda i: (0, 0)                          # weights resident across batch tiles
    out = pl.pallas_call(
        _mixed_mlp_kernel,
        out_shape=jax.ShapeDtypeStruct((B_pad, OUTP), jnp.float32),
        grid=(B_pad // BT,),
        in_specs=[
            pl.BlockSpec((BT, D), lambda i: (i, 0)),  # x batch tile (f32)
            pl.BlockSpec((D, 2 * H), const),          # fused layer-1 weights
            pl.BlockSpec((1, 2 * H), const),          # fused layer-1 bias
            pl.BlockSpec((2 * H, OUTP), const),       # fused, alpha-scaled layer-2 weights
            pl.BlockSpec((1, OUTP), const),           # mixed layer-2 bias
        ],
        out_specs=pl.BlockSpec((BT, OUTP), lambda i: (i, 0)),
        compiler_params=pltpu.CompilerParams(
            dimension_semantics=("parallel",)),
    )(xp, w1p, b1p, w2p, b2p)

    return out[:B, :OUT]


def _init_mlp_params(key, d_in, d_hidden, d_out):
    k1, k2, k3, k4 = jax.random.split(key, 4)
    w1 = jax.random.normal(k1, (d_in, d_hidden), jnp.float32) * 0.02
    b1 = jax.random.normal(k2, (1, d_hidden), jnp.float32) * 0.01
    w2 = jax.random.normal(k3, (d_hidden, d_out), jnp.float32) * 0.02
    b2 = jax.random.normal(k4, (1, d_out), jnp.float32) * 0.01
    return (w1, b1, w2, b2)


if __name__ == "__main__":
    key = jax.random.PRNGKey(0)
    kx, kl, kg = jax.random.split(key, 3)

    # Small NCHW input consistent with an image-classification client model.
    B, C, HH, WW = 2, 4, 16, 16
    D_IN = C * HH * WW          # 1024
    D_HID = 128
    D_OUT = 10
    ALPHA = 0.25

    x = jax.random.normal(kx, (B, C, HH, WW), jnp.float32)
    local_params = _init_mlp_params(kl, D_IN, D_HID, D_OUT)
    global_params = _init_mlp_params(kg, D_IN, D_HID, D_OUT)

    y = mixed_model_forward(x, local_params, global_params, ALPHA)
    y = jax.block_until_ready(y)

    # Pure-JAX reference with the same bf16 rounding points as the kernel.
    def bf(a):
        return a.astype(jnp.bfloat16).astype(jnp.float32)

    xf = bf(x.reshape(B, -1))
    wl1, bl1, wl2, bl2 = local_params
    wg1, bg1, wg2, bg2 = global_params
    hl = jnp.maximum(xf @ bf(wl1) + bl1, 0.0)
    hg = jnp.maximum(xf @ bf(wg1) + bg1, 0.0)
    y_ref = (bf(hl) @ bf(ALPHA * wl2)
             + bf(hg) @ bf((1.0 - ALPHA) * wg2)
             + ALPHA * bl2 + (1.0 - ALPHA) * bg2)

    assert y.shape == (B, D_OUT)
    assert jnp.allclose(y, y_ref, atol=1e-2, rtol=1e-2), "mismatch vs reference"

    print("KERNEL_OK")
</pallas_src>

<mosaic_0001>
module attributes {stable_mosaic.version = 11 : i64} {
  func.func @_mixed_mlp_kernel(%arg0: i32, %arg1: memref<8x1024xf32, #tpu.memory_space<vmem>>, %arg2: memref<1024x256xbf16, #tpu.memory_space<vmem>>, %arg3: memref<1x256xf32, #tpu.memory_space<vmem>>, %arg4: memref<256x128xbf16, #tpu.memory_space<vmem>>, %arg5: memref<1x128xf32, #tpu.memory_space<vmem>>, %arg6: memref<8x128xf32, #tpu.memory_space<vmem>>) attributes {dimension_semantics = [#tpu.dimension_semantics<parallel>], iteration_bounds = array<i64: 1>, scalar_prefetch = 0 : i64, scratch_operands = 0 : i64, tpu.core_type = #tpu.core_type<tc>, window_params = [{transform_indices = @transform_0, window_bounds = array<i64: 8, 1024>}, {pipeline_mode = #tpu.pipeline_mode<synchronous>, transform_indices = @transform_1, window_bounds = array<i64: 1024, 256>}, {pipeline_mode = #tpu.pipeline_mode<synchronous>, transform_indices = @transform_2, window_bounds = array<i64: 1, 256>}, {pipeline_mode = #tpu.pipeline_mode<synchronous>, transform_indices = @transform_3, window_bounds = array<i64: 256, 128>}, {pipeline_mode = #tpu.pipeline_mode<synchronous>, transform_indices = @transform_4, window_bounds = array<i64: 1, 128>}, {transform_indices = @transform_5, window_bounds = array<i64: 8, 128>}]} {
    %c0 = arith.constant 0 : index
    %c0_0 = arith.constant 0 : index
    %0 = vector.load %arg1[%c0, %c0_0] : memref<8x1024xf32, #tpu.memory_space<vmem>>, vector<8x1024xf32>
    %1 = arith.truncf %0 : vector<8x1024xf32> to vector<8x1024xbf16>
    %c0_1 = arith.constant 0 : index
    %c0_2 = arith.constant 0 : index
    %2 = vector.load %arg2[%c0_1, %c0_2] : memref<1024x256xbf16, #tpu.memory_space<vmem>>, vector<1024x256xbf16>
    %cst = arith.constant dense<0.000000e+00> : vector<8x256xf32>
    %3 = tpu.matmul %1, %2, %cst {dimension_numbers = #tpu.dot_dimension_numbers<[1], [0], [0], [1], [0, 0, 1, 1], [], []>} : vector<8x1024xbf16>, vector<1024x256xbf16>, vector<8x256xf32> -> vector<8x256xf32>
    %c0_3 = arith.constant 0 : index
    %c0_4 = arith.constant 0 : index
    %4 = vector.load %arg3[%c0_3, %c0_4] : memref<1x256xf32, #tpu.memory_space<vmem>>, vector<1x256xf32>
    %5 = vector.broadcast %4 : vector<1x256xf32> to vector<8x256xf32>
    %6 = arith.addf %3, %5 : vector<8x256xf32>
    %cst_5 = arith.constant 0.000000e+00 : f32
    %7 = vector.broadcast %cst_5 : f32 to vector<8x256xf32>
    %8 = arith.maximumf %6, %7 : vector<8x256xf32>
    %9 = arith.truncf %8 : vector<8x256xf32> to vector<8x256xbf16>
    %c0_6 = arith.constant 0 : index
    %c0_7 = arith.constant 0 : index
    %10 = vector.load %arg4[%c0_6, %c0_7] : memref<256x128xbf16, #tpu.memory_space<vmem>>, vector<256x128xbf16>
    %cst_8 = arith.constant dense<0.000000e+00> : vector<8x128xf32>
    %11 = tpu.matmul %9, %10, %cst_8 {dimension_numbers = #tpu.dot_dimension_numbers<[1], [0], [0], [1], [0, 0, 1, 1], [], []>} : vector<8x256xbf16>, vector<256x128xbf16>, vector<8x128xf32> -> vector<8x128xf32>
    %c0_9 = arith.constant 0 : index
    %c0_10 = arith.constant 0 : index
    %12 = vector.load %arg5[%c0_9, %c0_10] : memref<1x128xf32, #tpu.memory_space<vmem>>, vector<1x128xf32>
    %13 = vector.broadcast %12 : vector<1x128xf32> to vector<8x128xf32>
    %14 = arith.addf %11, %13 : vector<8x128xf32>
    %c0_11 = arith.constant 0 : index
    %c0_12 = arith.constant 0 : index
    %15 = vector.load %arg6[%c0_11, %c0_12] : memref<8x128xf32, #tpu.memory_space<vmem>>, vector<8x128xf32>
    tpu.vector_store %arg6[%c0_11, %c0_12], %14 {strides = array<i32>} : memref<8x128xf32, #tpu.memory_space<vmem>>, vector<8x128xf32>,
    return
  }
  func.func @transform_0(%arg0: i32) -> (i32, i32) {
    %c0_i32 = arith.constant 0 : i32
    %c0_i32_0 = arith.constant 0 : i32
    return %arg0, %c0_i32 : i32, i32
  }
  func.func @transform_1(%arg0: i32) -> (i32, i32) {
    %c0_i32 = arith.constant 0 : i32
    %c0_i32_0 = arith.constant 0 : i32
    %c0_i32_1 = arith.constant 0 : i32
    return %c0_i32, %c0_i32_0 : i32, i32
  }
  func.func @transform_2(%arg0: i32) -> (i32, i32) {
    %c0_i32 = arith.constant 0 : i32
    %c0_i32_0 = arith.constant 0 : i32
    %c0_i32_1 = arith.constant 0 : i32
    return %c0_i32, %c0_i32_0 : i32, i32
  }
  func.func @transform_3(%arg0: i32) -> (i32, i32) {
    %c0_i32 = arith.constant 0 : i32
    %c0_i32_0 = arith.constant 0 : i32
    %c0_i32_1 = arith.constant 0 : i32
    return %c0_i32, %c0_i32_0 : i32, i32
  }
  func.func @transform_4(%arg0: i32) -> (i32, i32) {
    %c0_i32 = arith.constant 0 : i32
    %c0_i32_0 = arith.constant 0 : i32
    %c0_i32_1 = arith.constant 0 : i32
    return %c0_i32, %c0_i32_0 : i32, i32
  }
  func.func @transform_5(%arg0: i32) -> (i32, i32) {
    %c0_i32 = arith.constant 0 : i32
    %c0_i32_0 = arith.constant 0 : i32
    return %arg0, %c0_i32 : i32, i32
  }
}

</mosaic_0001>

<bundles_post_ra>
// kernel: tpu_custom_call.1
= control target key start
LH: loop header
LB: loop body
LE: loop exit
PB: predicated region body
PF: predicated region fallthrough
CT: control target
= control target key end

     0   :  { %10 = vsyncpa [#allocation3], 0  ;;  %s1798_s0 = inlined_call_operand.hbm [shape: f32[8,1024], index: 0, kind: input, shape index: {}]   ;;  %s1799_s1 = inlined_call_operand.hbm [shape: bf16[1024,256], index: 1, kind: input, shape index: {}]   ;;  %s1800_s2 = inlined_call_operand.vmem [shape: f32[1,256], index: 2, kind: input, shape index: {}]   ;;  %s1801_s3 = inlined_call_operand.hbm [shape: bf16[256,128], index: 3, kind: input, shape index: {}]   ;;  %s1802_s4 = inlined_call_operand.vmem [shape: f32[1,128], index: 4, kind: input, shape index: {}]   ;;  %s1803_s5 = inlined_call_operand.hbm [shape: f32[8,128], index: 5, kind: output, shape index: {}]  }
   0x1   :  { %11 = vsyncpa [#allocation6], 0 }
   0x2   :  { %12 = vsyncpa [#allocation4], 0  ;;  %s1706_s18 = smov [#allocation5]   ;;  %s1612_s22 = scalar_lea.hbm %s1799_s1, 16384 }
   0x3   :  { %s28_s19 = sshll.u32 %s1706_s18, 4  ;;  %p1613_p0 = scmp.ne.s32.totalorder %s1799_s1, %s1612_s22  ;;  %s29_s19 = int_to_ptr.vmem [resolvable:$true] %s28_s19 }
   0x4   :  { %p1616_p1 = scmp.lt.u32.totalorder %s1612_s22, %s1799_s1 }
   0x6   :  { %p1618_p2 = pnand %p1616_p1, %p1613_p0 }
   0x8   :  { %1621 = shalt.err (!%p1618_p2)
}
   0x9   :  { %s1622_s27 = scalar_lea.vmem %s29_s19, 16384  ;;  %p1627_p4 = scmp.lt.s32.totalorder %s29_s19, %s29_s19 }
   0xa   :  { %p1623_p3 = scmp.ne.s32.totalorder %s29_s19, %s1622_s27  ;;  %p1628_p5 = scmp.lt.s32.totalorder %s1622_s27, %s1622_s27 }
   0xc   :  { %p1629_p6 = por %p1628_p5, %p1627_p4 }
   0xe   :  { %p1630_p7 = pnand %p1629_p6, %p1623_p3 }
  0x10   :  { %1633 = shalt.err (!%p1630_p7)
}
  0x11   :  { %s1707_s28 = smov 128   ;;  %s1708_s29 = smov 8  }
  0x12   :  { %34 = dma.hbm_to_vmem [thread:$0]  %s1799_s1, 16384, %s29_s19, [#allocation6], %s1707_s28, %s1707_s28, %s1708_s29  }
  0x13   :  { %s1709_s7 = smov [#allocation2]   ;;  %s1710_s9 = smov [#allocation7]  }
  0x14   :  { %s19_s8 = sshll.u32 %s1709_s7, 4  ;;  %s42_s10 = sshll.u32 %s1710_s9, 4  ;;  %s20_s8 = int_to_ptr.vmem [resolvable:$true] %s19_s8  ;;  %s43_s10 = int_to_ptr.vmem [resolvable:$true] %s42_s10 }
  0x15   :  { %s1634_s13 = scalar_lea.hbm %s1798_s0, 1024 }
  0x16   :  { %p1635_p8 = scmp.ne.s32.totalorder %s1798_s0, %s1634_s13  ;;  %p1638_p9 = scmp.lt.u32.totalorder %s1634_s13, %s1798_s0 }
  0x18   :  { %p1640_p10 = pnand %p1638_p9, %p1635_p8 }
  0x1a   :  { %1643 = shalt.err (!%p1640_p10)
}
  0x1b   :  { %s1644_s1 = scalar_lea.vmem %s20_s8, 1024  ;;  %p1649_p12 = scmp.lt.s32.totalorder %s20_s8, %s20_s8 }
  0x1c   :  { %p1645_p11 = scmp.ne.s32.totalorder %s20_s8, %s1644_s1  ;;  %p1650_p13 = scmp.lt.s32.totalorder %s1644_s1, %s1644_s1 }
  0x1e   :  { %p1651_p0 = por %p1650_p13, %p1649_p12 }
  0x20   :  { %p1652_p1 = pnand %p1651_p0, %p1645_p11 }
  0x22   :  { %1655 = shalt.err (!%p1652_p1)
}
  0x23   :  { %22 = dma.hbm_to_vmem [thread:$0]  %s1798_s0, 1024, %s20_s8, [#allocation3]  }
  0x24   :  { %s1656_s22 = scalar_lea.hbm %s1801_s3, 2048 }
  0x25   :  { %p1657_p2 = scmp.ne.s32.totalorder %s1801_s3, %s1656_s22  ;;  %p1660_p3 = scmp.lt.u32.totalorder %s1656_s22, %s1801_s3 }
  0x27   :  { %p1662_p4 = pnand %p1660_p3, %p1657_p2 }
  0x29   :  { %1665 = shalt.err (!%p1662_p4)
}
  0x2a   :  { %s1666_s27 = scalar_lea.vmem %s43_s10, 2048  ;;  %p1671_p6 = scmp.lt.s32.totalorder %s43_s10, %s43_s10 }
  0x2b   :  { %p1667_p5 = scmp.ne.s32.totalorder %s43_s10, %s1666_s27  ;;  %p1672_p7 = scmp.lt.s32.totalorder %s1666_s27, %s1666_s27 }
  0x2d   :  { %p1673_p8 = por %p1672_p7, %p1671_p6 }
  0x2f   :  { %p1674_p9 = pnand %p1673_p8, %p1667_p5 }
  0x31   :  { %1677 = shalt.err (!%p1674_p9)
}
  0x32   :  { %s1711_s0 = smov 64   ;;  %s1712_s28 = smov 4  }
  0x33   :  { %48 = dma.hbm_to_vmem [thread:$0]  %s1801_s3, 2048, %s43_s10, [#allocation6], %s1711_s0, %s1711_s0, %s1712_s28  }
  0x34   :  { %1700 = dma.done.wait [#allocation3], 1024  }
  0x35   :  { %1701 = vsyncadd [#allocation3], 4294966272 }
  0x36   :  { %1702 = dma.done.wait [#allocation6], 18432  }
  0x37   :  { %1703 = vsyncadd [#allocation6], 4294948864  ;;  %v1404_v0 = vld [vmem:[#allocation5 + $0x4] ss:$8 sps:$4 sm:$0xff]   ;;  %v1408_v2 = vld [vmem:[#allocation5] ss:$8 sps:$4 sm:$0xff]  }
  0x38   :  { %v1406_v1 = vld [vmem:[#allocation5 + $0x204] ss:$8 sps:$4 sm:$0xff]   ;;  %857 = vmatprep.subr.bf16.mxu1 %v1404_v0  ;;  %v1409_v3 = vld [vmem:[#allocation5 + $0x200] ss:$8 sps:$4 sm:$0xff]   ;;  %v1410_v4 = vld [vmem:[#allocation5 + $0x14] ss:$8 sps:$4 sm:$0xff]  }
  0x39   :  { %939 = vmatprep.subr.bf16.mxu0 %v1406_v1  ;;  %858 = vmatpush1.bf16.msra.mxu1 %v1408_v2  ;;  %v1412_v5 = vld [vmem:[#allocation5 + $0x214] ss:$8 sps:$4 sm:$0xff]   ;;  %v1414_v6 = vld [vmem:[#allocation5 + $0x10] ss:$8 sps:$4 sm:$0xff]   ;;  %v1416_v8 = vld [vmem:[#allocation5 + $0x24] ss:$8 sps:$4 sm:$0xff]  }
  0x3a   :  { %940 = vmatpush1.bf16.msra.mxu0 %v1409_v3  ;;  %859 = vmatprep.subr.bf16.mxu1 %v1410_v4  ;;  %v1415_v7 = vld [vmem:[#allocation5 + $0x210] ss:$8 sps:$4 sm:$0xff]   ;;  %v1418_v9 = vld [vmem:[#allocation5 + $0x224] ss:$8 sps:$4 sm:$0xff]   ;;  %v1420_v10 = vld [vmem:[#allocation5 + $0x20] ss:$8 sps:$4 sm:$0xff]  }
  0x3b   :  { %941 = vmatprep.subr.bf16.mxu0 %v1412_v5  ;;  %v1421_v11 = vld [vmem:[#allocation5 + $0x220] ss:$8 sps:$4 sm:$0xff]   ;;  %v1422_v12 = vld [vmem:[#allocation5 + $0x34] ss:$8 sps:$4 sm:$0xff]   ;;  %v1426_v14 = vld [vmem:[#allocation5 + $0x30] ss:$8 sps:$4 sm:$0xff]  }
  0x3c   :  { %v1424_v13 = vld [vmem:[#allocation5 + $0x234] ss:$8 sps:$4 sm:$0xff]   ;;  %v1427_v15 = vld [vmem:[#allocation5 + $0x230] ss:$8 sps:$4 sm:$0xff]   ;;  %v1428_v16 = vld [vmem:[#allocation5 + $0x44] ss:$8 sps:$4 sm:$0xff]  }
  0x3d   :  { %860 = vmatpush1.bf16.msra.mxu1 %v1414_v6  ;;  %v1430_v17 = vld [vmem:[#allocation5 + $0x244] ss:$8 sps:$4 sm:$0xff]   ;;  %v1432_v18 = vld [vmem:[#allocation5 + $0x40] ss:$8 sps:$4 sm:$0xff]   ;;  %v1434_v20 = vld [vmem:[#allocation5 + $0x54] ss:$8 sps:$4 sm:$0xff]  }
  0x3e   :  { %942 = vmatpush1.bf16.msra.mxu0 %v1415_v7  ;;  %861 = vmatprep.subr.bf16.mxu1 %v1416_v8  ;;  %v1433_v19 = vld [vmem:[#allocation5 + $0x240] ss:$8 sps:$4 sm:$0xff]   ;;  %v1436_v21 = vld [vmem:[#allocation5 + $0x254] ss:$8 sps:$4 sm:$0xff]   ;;  %v1438_v22 = vld [vmem:[#allocation5 + $0x50] ss:$8 sps:$4 sm:$0xff]  }
  0x3f   :  { %943 = vmatprep.subr.bf16.mxu0 %v1418_v9  ;;  %v1439_v23 = vld [vmem:[#allocation5 + $0x250] ss:$8 sps:$4 sm:$0xff]   ;;  %v1440_v24 = vld [vmem:[#allocation5 + $0x64] ss:$8 sps:$4 sm:$0xff]   ;;  %v1444_v26 = vld [vmem:[#allocation5 + $0x60] ss:$8 sps:$4 sm:$0xff]  }
  0x40   :  { %v1442_v25 = vld [vmem:[#allocation5 + $0x264] ss:$8 sps:$4 sm:$0xff]   ;;  %v1445_v27 = vld [vmem:[#allocation5 + $0x260] ss:$8 sps:$4 sm:$0xff]   ;;  %v1446_v28 = vld [vmem:[#allocation5 + $0x74] ss:$8 sps:$4 sm:$0xff]  }
  0x41   :  { %862 = vmatpush1.bf16.msra.mxu1 %v1420_v10  ;;  %v1448_v29 = vld [vmem:[#allocation5 + $0x274] ss:$8 sps:$4 sm:$0xff]   ;;  %v1450_v30 = vld [vmem:[#allocation5 + $0x70] ss:$8 sps:$4 sm:$0xff]   ;;  %v1452_v32 = vld [vmem:[#allocation5 + $0x84] ss:$8 sps:$4 sm:$0xff]  }
  0x42   :  { %944 = vmatpush1.bf16.msra.mxu0 %v1421_v11  ;;  %863 = vmatprep.subr.bf16.mxu1 %v1422_v12  ;;  %v1451_v31 = vld [vmem:[#allocation5 + $0x270] ss:$8 sps:$4 sm:$0xff]   ;;  %v1454_v33 = vld [vmem:[#allocation5 + $0x284] ss:$8 sps:$4 sm:$0xff]   ;;  %v1456_v34 = vld [vmem:[#allocation5 + $0x80] ss:$8 sps:$4 sm:$0xff]  }
  0x43   :  { %945 = vmatprep.subr.bf16.mxu0 %v1424_v13  ;;  %v1457_v35 = vld [vmem:[#allocation5 + $0x280] ss:$8 sps:$4 sm:$0xff]   ;;  %v1458_v36 = vld [vmem:[#allocation5 + $0x94] ss:$8 sps:$4 sm:$0xff]   ;;  %v1462_v38 = vld [vmem:[#allocation5 + $0x90] ss:$8 sps:$4 sm:$0xff]  }
  0x44   :  { %v1460_v37 = vld [vmem:[#allocation5 + $0x294] ss:$8 sps:$4 sm:$0xff]   ;;  %v1463_v39 = vld [vmem:[#allocation5 + $0x290] ss:$8 sps:$4 sm:$0xff]   ;;  %v1464_v40 = vld [vmem:[#allocation5 + $0xa4] ss:$8 sps:$4 sm:$0xff]  }
  0x45   :  { %864 = vmatpush1.bf16.msra.mxu1 %v1426_v14  ;;  %v1466_v41 = vld [vmem:[#allocation5 + $0x2a4] ss:$8 sps:$4 sm:$0xff]   ;;  %v1468_v42 = vld [vmem:[#allocation5 + $0xa0] ss:$8 sps:$4 sm:$0xff]   ;;  %v1470_v44 = vld [vmem:[#allocation5 + $0xb4] ss:$8 sps:$4 sm:$0xff]  }
  0x46   :  { %946 = vmatpush1.bf16.msra.mxu0 %v1427_v15  ;;  %865 = vmatprep.subr.bf16.mxu1 %v1428_v16  ;;  %v1469_v43 = vld [vmem:[#allocation5 + $0x2a0] ss:$8 sps:$4 sm:$0xff]   ;;  %v1472_v45 = vld [vmem:[#allocation5 + $0x2b4] ss:$8 sps:$4 sm:$0xff]   ;;  %v1474_v47 = vld [vmem:[#allocation5 + $0xb0] ss:$8 sps:$4 sm:$0xff]  }
  0x47   :  { %947 = vmatprep.subr.bf16.mxu0 %v1430_v17  ;;  %v62_v46 = vld [vmem:[#allocation2 + $0x8] sm:$0xff]  ;;  %v1475_v49 = vld [vmem:[#allocation5 + $0x2b0] ss:$8 sps:$4 sm:$0xff]   ;;  %v1482_v56 = vld [vmem:[#allocation5 + $0xd4] ss:$8 sps:$4 sm:$0xff]   ;;  %s1713_s8 = smov [#allocation8]  }
  0x48   :  { %v70_v48 = vpack.c.bf16 %v62_v46, %v62_v46  ;;  %v66_v50 = vld [vmem:[#allocation2 + $0x28] sm:$0xff]  ;;  %v1484_v57 = vld [vmem:[#allocation5 + $0x2d4] ss:$8 sps:$4 sm:$0xff]   ;;  %v1486_v58 = vld [vmem:[#allocation5 + $0xd0] ss:$8 sps:$4 sm:$0xff]   ;;  %s1207_s9 = sshll.u32 %s1713_s8, 4  ;;  %s1208_s9 = int_to_ptr.vmem [resolvable:$true] %s1207_s9 }
  0x49   :  { %866 = vmatpush1.bf16.msra.mxu1 %v1432_v18  ;;  %v1476_v51 = vld [vmem:[#allocation5 + $0xc4] ss:$8 sps:$4 sm:$0xff]   ;;  %v74_v53 = vpack.c.bf16 %v66_v50, %v66_v50  ;;  %v1480_v54 = vld [vmem:[#allocation5 + $0xc0] ss:$8 sps:$4 sm:$0xff]   ;;  %v1487_v59 = vld [vmem:[#allocation5 + $0x2d0] ss:$8 sps:$4 sm:$0xff]   ;;  %p1683_p11 = scmp.lt.s32.totalorder %s1208_s9, %s1208_s9 }
  0x4a   :  { %948 = vmatpush1.bf16.msra.mxu0 %v1433_v19  ;;  %867 = vmatprep.subr.bf16.mxu1 %v1434_v20  ;;  %v1478_v52 = vld [vmem:[#allocation5 + $0x2c4] ss:$8 sps:$4 sm:$0xff]   ;;  %v1481_v55 = vld [vmem:[#allocation5 + $0x2c0] ss:$8 sps:$4 sm:$0xff]   ;;  %v1494_v0 = vld [vmem:[#allocation5 + $0xf4] ss:$8 sps:$4 sm:$0xff]  }
  0x4b   :  { %949 = vmatprep.subr.bf16.mxu0 %v1436_v21  ;;  %889 = vmatprep.mubr.bf16.mxu1 %v70_v48  ;;  %v1488_v60 = vld [vmem:[#allocation5 + $0xe4] ss:$8 sps:$4 sm:$0xff]   ;;  %v1492_v62 = vld [vmem:[#allocation5 + $0xe0] ss:$8 sps:$4 sm:$0xff]   ;;  %v1496_v1 = vld [vmem:[#allocation5 + $0x2f4] ss:$8 sps:$4 sm:$0xff]  }
  0x4c   :  { %971 = vmatprep.mubr.bf16.mxu0 %v74_v53  ;;  %v1490_v61 = vld [vmem:[#allocation5 + $0x2e4] ss:$8 sps:$4 sm:$0xff]   ;;  %v1493_v63 = vld [vmem:[#allocation5 + $0x2e0] ss:$8 sps:$4 sm:$0xff]   ;;  %v1498_v2 = vld [vmem:[#allocation5 + $0xf0] ss:$8 sps:$4 sm:$0xff]  }
  0x4d   :  { %868 = vmatpush1.bf16.msra.mxu1 %v1438_v22  ;;  %v1499_v3 = vld [vmem:[#allocation5 + $0x2f0] ss:$8 sps:$4 sm:$0xff]   ;;  %v1502_v4 = vld [vmem:[#allocation5 + $0x104] ss:$8 sps:$4 sm:$0xff]   ;;  %v1500_v8 = vld [vmem:[#allocation5 + $0x100] ss:$8 sps:$4 sm:$0xff]  }
  0x4e   :  { %950 = vmatpush1.bf16.msra.mxu0 %v1439_v23  ;;  %869 = vmatprep.subr.bf16.mxu1 %v1440_v24  ;;  %v61_v5 = vld [vmem:[#allocation2] sm:$0xff]  ;;  %v1508_v12 = vld [vmem:[#allocation5 + $0x114] ss:$8 sps:$4 sm:$0xff]   ;;  %v1506_v14 = vld [vmem:[#allocation5 + $0x110] ss:$8 sps:$4 sm:$0xff]   ;;  %s1678_s10 = scalar_lea.vmem %s1208_s9, 128 }
  0x4f   :  { %951 = vmatprep.subr.bf16.mxu0 %v1442_v25  ;;  %v65_v6 = vld [vmem:[#allocation2 + $0x20] sm:$0xff]  ;;  %v69_v10 = vpack.c.bf16 %v61_v5, %v61_v5  ;;  %v1511_v13 = vld [vmem:[#allocation5 + $0x314] ss:$8 sps:$4 sm:$0xff]   ;;  %v1509_v15 = vld [vmem:[#allocation5 + $0x310] ss:$8 sps:$4 sm:$0xff]   ;;  %p1679_p10 = scmp.ne.s32.totalorder %s1208_s9, %s1678_s10  ;;  %p1684_p12 = scmp.lt.s32.totalorder %s1678_s10, %s1678_s10 }
  0x50   :  { %v1505_v7 = vld [vmem:[#allocation5 + $0x304] ss:$8 sps:$4 sm:$0xff]   ;;  %v1503_v9 = vld [vmem:[#allocation5 + $0x300] ss:$8 sps:$4 sm:$0xff]   ;;  %v73_v11 = vpack.c.bf16 %v65_v6, %v65_v6  ;;  %v1520_v20 = vld [vmem:[#allocation5 + $0x134] ss:$8 sps:$4 sm:$0xff]  }
  0x51   :  { %870 = vmatpush1.bf16.msra.mxu1 %v1444_v26  ;;  %v1514_v16 = vld [vmem:[#allocation5 + $0x124] ss:$8 sps:$4 sm:$0xff]   ;;  %v1512_v18 = vld [vmem:[#allocation5 + $0x120] ss:$8 sps:$4 sm:$0xff]   ;;  %v1523_v21 = vld [vmem:[#allocation5 + $0x334] ss:$8 sps:$4 sm:$0xff]   ;;  %p1685_p13 = por %p1684_p12, %p1683_p11 }
  0x52   :  { %952 = vmatpush1.bf16.msra.mxu0 %v1445_v27  ;;  %871 = vmatprep.subr.bf16.mxu1 %v1446_v28  ;;  %v1517_v17 = vld [vmem:[#allocation5 + $0x324] ss:$8 sps:$4 sm:$0xff]   ;;  %v1515_v19 = vld [vmem:[#allocation5 + $0x320] ss:$8 sps:$4 sm:$0xff]   ;;  %v1518_v22 = vld [vmem:[#allocation5 + $0x130] ss:$8 sps:$4 sm:$0xff]  }
  0x53   :  { %953 = vmatprep.subr.bf16.mxu0 %v1448_v29  ;;  %v1521_v23 = vld [vmem:[#allocation5 + $0x330] ss:$8 sps:$4 sm:$0xff]   ;;  %v1526_v24 = vld [vmem:[#allocation5 + $0x144] ss:$8 sps:$4 sm:$0xff]   ;;  %v1524_v26 = vld [vmem:[#allocation5 + $0x140] ss:$8 sps:$4 sm:$0xff]   ;;  %p1686_p0 = pnand %p1685_p13, %p1679_p10 }
  0x54   :  { %v1529_v25 = vld [vmem:[#allocation5 + $0x344] ss:$8 sps:$4 sm:$0xff]   ;;  %v1527_v27 = vld [vmem:[#allocation5 + $0x340] ss:$8 sps:$4 sm:$0xff]   ;;  %v1532_v28 = vld [vmem:[#allocation5 + $0x154] ss:$8 sps:$4 sm:$0xff]  }
  0x55   :  { %872 = vmatpush1.bf16.msra.mxu1 %v1450_v30  ;;  %v1535_v29 = vld [vmem:[#allocation5 + $0x354] ss:$8 sps:$4 sm:$0xff]   ;;  %v1530_v30 = vld [vmem:[#allocation5 + $0x150] ss:$8 sps:$4 sm:$0xff]   ;;  %v1548_v46 = vld [vmem:[#allocation5 + $0x180] ss:$8 sps:$4 sm:$0xff]  }
  0x56   :  { %954 = vmatpush1.bf16.msra.mxu0 %v1451_v31  ;;  %873 = vmatprep.subr.bf16.mxu1 %v1452_v32  ;;  %v1533_v31 = vld [vmem:[#allocation5 + $0x350] ss:$8 sps:$4 sm:$0xff]   ;;  %v1538_v32 = vld [vmem:[#allocation5 + $0x164] ss:$8 sps:$4 sm:$0xff]   ;;  %v1556_v48 = vld [vmem:[#allocation5 + $0x194] ss:$8 sps:$4 sm:$0xff]  }
  0x57   :  { %955 = vmatprep.subr.bf16.mxu0 %v1454_v33  ;;  %v1541_v33 = vld [vmem:[#allocation5 + $0x364] ss:$8 sps:$4 sm:$0xff]   ;;  %v1554_v50 = vld [vmem:[#allocation5 + $0x190] ss:$8 sps:$4 sm:$0xff]   ;;  %v1584_v6 = vld [vmem:[#allocation5 + $0x1e0] ss:$8 sps:$4 sm:$0xff]  }
  0x58   :  { %v1565_v53 = vld [vmem:[#allocation5 + $0x3a4] ss:$8 sps:$4 sm:$0xff]  }
  0x59   :  { %874 = vmatpush1.bf16.msra.mxu1 %v1456_v34  ;;  %v64_v34 = vld [vmem:[#allocation2 + $0x18] sm:$0xff]  ;;  %v1589_v5 = vld [vmem:[#allocation5 + $0x3e4] ss:$8 sps:$4 sm:$0xff]  }
  0x5a   :  { %956 = vmatpush1.bf16.msra.mxu0 %v1457_v35  ;;  %875 = vmatprep.subr.bf16.mxu1 %v1458_v36  ;;  %v1536_v35 = vld [vmem:[#allocation5 + $0x160] ss:$8 sps:$4 sm:$0xff]  }
  0x5b   :  { %957 = vmatprep.subr.bf16.mxu0 %v1460_v37  ;;  %v1539_v36 = vld [vmem:[#allocation5 + $0x360] ss:$8 sps:$4 sm:$0xff]   ;;  %v72_v37 = vpack.c.bf16 %v64_v34, %v64_v34 }
  0x5d   :  { %876 = vmatpush1.bf16.msra.mxu1 %v1462_v38  ;;  %v68_v38 = vld [vmem:[#allocation2 + $0x38] sm:$0xff] }
  0x5e   :  { %958 = vmatpush1.bf16.msra.mxu0 %v1463_v39  ;;  %877 = vmatprep.subr.bf16.mxu1 %v1464_v40  ;;  %v1544_v39 = vld [vmem:[#allocation5 + $0x174] ss:$8 sps:$4 sm:$0xff]   ;;  %v76_v40 = vpack.c.bf16 %v68_v38, %v68_v38 }
  0x5f   :  { %959 = vmatprep.subr.bf16.mxu0 %v1466_v41  ;;  %v1547_v41 = vld [vmem:[#allocation5 + $0x374] ss:$8 sps:$4 sm:$0xff]  }
  0x61   :  { %878 = vmatpush1.bf16.msra.mxu1 %v1468_v42  ;;  %v1542_v42 = vld [vmem:[#allocation5 + $0x170] ss:$8 sps:$4 sm:$0xff]  }
  0x62   :  { %960 = vmatpush1.bf16.msra.mxu0 %v1469_v43  ;;  %879 = vmatprep.subr.bf16.mxu1 %v1470_v44  ;;  %v1545_v43 = vld [vmem:[#allocation5 + $0x370] ss:$8 sps:$4 sm:$0xff]   ;;  %v1550_v44 = vld [vmem:[#allocation5 + $0x184] ss:$8 sps:$4 sm:$0xff]  }
  0x63   :  { %961 = vmatprep.subr.bf16.mxu0 %v1472_v45  ;;  %v1553_v45 = vld [vmem:[#allocation5 + $0x384] ss:$8 sps:$4 sm:$0xff]  }
  0x65   :  { %880 = vmatpush1.bf16.msra.mxu1 %v1474_v47  ;;  %v1551_v47 = vld [vmem:[#allocation5 + $0x380] ss:$8 sps:$4 sm:$0xff]  }
  0x66   :  { %962 = vmatpush1.bf16.msra.mxu0 %v1475_v49  ;;  %881 = vmatprep.subr.bf16.mxu1 %v1476_v51  ;;  %v1559_v49 = vld [vmem:[#allocation5 + $0x394] ss:$8 sps:$4 sm:$0xff]   ;;  %v1557_v51 = vld [vmem:[#allocation5 + $0x390] ss:$8 sps:$4 sm:$0xff]  }
  0x67   :  { %963 = vmatprep.subr.bf16.mxu0 %v1478_v52  ;;  %v1562_v52 = vld [vmem:[#allocation5 + $0x1a4] ss:$8 sps:$4 sm:$0xff]  }
  0x69   :  { %882 = vmatpush1.bf16.msra.mxu1 %v1480_v54  ;;  %v1560_v54 = vld [vmem:[#allocation5 + $0x1a0] ss:$8 sps:$4 sm:$0xff]  }
  0x6a   :  { %964 = vmatpush1.bf16.msra.mxu0 %v1481_v55  ;;  %883 = vmatprep.subr.bf16.mxu1 %v1482_v56  ;;  %v1563_v55 = vld [vmem:[#allocation5 + $0x3a0] ss:$8 sps:$4 sm:$0xff]   ;;  %v1568_v56 = vld [vmem:[#allocation5 + $0x1b4] ss:$8 sps:$4 sm:$0xff]  }
  0x6b   :  { %965 = vmatprep.subr.bf16.mxu0 %v1484_v57  ;;  %v1571_v57 = vld [vmem:[#allocation5 + $0x3b4] ss:$8 sps:$4 sm:$0xff]  }
  0x6d   :  { %884 = vmatpush1.bf16.msra.mxu1 %v1486_v58  ;;  %v1566_v58 = vld [vmem:[#allocation5 + $0x1b0] ss:$8 sps:$4 sm:$0xff]  }
  0x6e   :  { %966 = vmatpush1.bf16.msra.mxu0 %v1487_v59  ;;  %885 = vmatprep.subr.bf16.mxu1 %v1488_v60  ;;  %v1569_v59 = vld [vmem:[#allocation5 + $0x3b0] ss:$8 sps:$4 sm:$0xff]   ;;  %v1574_v60 = vld [vmem:[#allocation5 + $0x1c4] ss:$8 sps:$4 sm:$0xff]  }
  0x6f   :  { %967 = vmatprep.subr.bf16.mxu0 %v1490_v61  ;;  %v1577_v61 = vld [vmem:[#allocation5 + $0x3c4] ss:$8 sps:$4 sm:$0xff]  }
  0x71   :  { %886 = vmatpush1.bf16.msra.mxu1 %v1492_v62  ;;  %v1572_v62 = vld [vmem:[#allocation5 + $0x1c0] ss:$8 sps:$4 sm:$0xff]  }
  0x72   :  { %968 = vmatpush1.bf16.msra.mxu0 %v1493_v63  ;;  %887 = vmatprep.subr.bf16.mxu1 %v1494_v0  ;;  %v1575_v63 = vld [vmem:[#allocation5 + $0x3c0] ss:$8 sps:$4 sm:$0xff]   ;;  %v1580_v0 = vld [vmem:[#allocation5 + $0x1d4] ss:$8 sps:$4 sm:$0xff]  }
  0x73   :  { %969 = vmatprep.subr.bf16.mxu0 %v1496_v1  ;;  %v1583_v1 = vld [vmem:[#allocation5 + $0x3d4] ss:$8 sps:$4 sm:$0xff]  }
  0x75   :  { %888 = vmatpush1.bf16.msra.mxu1 %v1498_v2  ;;  %v1578_v2 = vld [vmem:[#allocation5 + $0x1d0] ss:$8 sps:$4 sm:$0xff]  }
  0x76   :  { %970 = vmatpush1.bf16.msra.mxu0 %v1499_v3  ;;  %898 = vmatprep.subr.bf16.mxu1 %v1502_v4  ;;  %v1581_v3 = vld [vmem:[#allocation5 + $0x3d0] ss:$8 sps:$4 sm:$0xff]   ;;  %v1586_v4 = vld [vmem:[#allocation5 + $0x1e4] ss:$8 sps:$4 sm:$0xff]  }
  0x77   :  { %980 = vmatprep.subr.bf16.mxu0 %v1505_v7  ;;  %v1587_v7 = vld [vmem:[#allocation5 + $0x3e0] ss:$8 sps:$4 sm:$0xff]  }
  0x78   :  { %890 = vmatmul.mubr.bf16.vlgmr.msra.gmra.mrb[0].mxu1 %v69_v10  ;;  %v1590_v10 = vld [vmem:[#allocation5 + $0x1f0] ss:$8 sps:$4 sm:$0xff]  }
  0x79   :  { %972 = vmatmul.mubr.bf16.vlgmr.msra.gmra.mrb[0].mxu0 %v73_v11  ;;  %899 = vmatpush1.bf16.msra.mxu1 %v1500_v8  ;;  %v1592_v8 = vld [vmem:[#allocation5 + $0x1f4] ss:$8 sps:$4 sm:$0xff]   ;;  %v1593_v11 = vld [vmem:[#allocation5 + $0x3f0] ss:$8 sps:$4 sm:$0xff]  }
  0x7a   :  { %981 = vmatpush1.bf16.msra.mxu0 %v1503_v9  ;;  %900 = vmatprep.subr.bf16.mxu1 %v1508_v12  ;;  %v1595_v9 = vld [vmem:[#allocation5 + $0x3f4] ss:$8 sps:$4 sm:$0xff]  }
  0x7b   :  { %982 = vmatprep.subr.bf16.mxu0 %v1511_v13  ;;  %930 = vmatprep.mubr.bf16.mxu1 %v72_v37  ;;  %v63_v12 = vld [vmem:[#allocation2 + $0x10] sm:$0xff] }
  0x7c   :  { %1012 = vmatprep.mubr.bf16.mxu0 %v76_v40  ;;  %v67_v13 = vld [vmem:[#allocation2 + $0x30] sm:$0xff] }
  0x7d   :  { %901 = vmatpush1.bf16.msra.mxu1 %v1506_v14  ;;  %v1596_v14 = vld [vmem:[#allocation7 + $0x40] sm:$0xff]  }
  0x7e   :  { %983 = vmatpush1.bf16.msra.mxu0 %v1509_v15  ;;  %902 = vmatprep.subr.bf16.mxu1 %v1514_v16  ;;  %v71_v15 = vpack.c.bf16 %v63_v12, %v63_v12  ;;  %v75_v16 = vpack.c.bf16 %v67_v13, %v67_v13 }
  0x7f   :  { %984 = vmatprep.subr.bf16.mxu0 %v1517_v17  ;;  %v1597_v17 = vld [vmem:[#allocation7] sm:$0xff]  }
  0x81   :  { %903 = vmatpush1.bf16.msra.mxu1 %v1512_v18  ;;  %v1598_v18 = vld [vmem:[#allocation7 + $0x48] sm:$0xff]  }
  0x82   :  { %985 = vmatpush1.bf16.msra.mxu0 %v1515_v19  ;;  %904 = vmatprep.subr.bf16.mxu1 %v1520_v20  ;;  %v1599_v19 = vld [vmem:[#allocation7 + $0x8] sm:$0xff]   ;;  %v1600_v20 = vld [vmem:[#allocation7 + $0x50] sm:$0xff]  }
  0x83   :  { %986 = vmatprep.subr.bf16.mxu0 %v1523_v21  ;;  %v1601_v21 = vld [vmem:[#allocation7 + $0x10] sm:$0xff]  }
  0x85   :  { %905 = vmatpush1.bf16.msra.mxu1 %v1518_v22  ;;  %v1602_v22 = vld [vmem:[#allocation7 + $0x58] sm:$0xff]  }
  0x86   :  { %987 = vmatpush1.bf16.msra.mxu0 %v1521_v23  ;;  %906 = vmatprep.subr.bf16.mxu1 %v1526_v24  ;;  %v1603_v23 = vld [vmem:[#allocation7 + $0x18] sm:$0xff]   ;;  %v1604_v24 = vld [vmem:[#allocation7 + $0x60] sm:$0xff]  }
  0x87   :  { %988 = vmatprep.subr.bf16.mxu0 %v1529_v25  ;;  %v1605_v25 = vld [vmem:[#allocation7 + $0x20] sm:$0xff]  }
  0x89   :  { %907 = vmatpush1.bf16.msra.mxu1 %v1524_v26  ;;  %v1606_v26 = vld [vmem:[#allocation7 + $0x68] sm:$0xff]  }
  0x8a   :  { %989 = vmatpush1.bf16.msra.mxu0 %v1527_v27  ;;  %908 = vmatprep.subr.bf16.mxu1 %v1532_v28  ;;  %v1607_v27 = vld [vmem:[#allocation7 + $0x28] sm:$0xff]   ;;  %v1608_v28 = vld [vmem:[#allocation7 + $0x70] sm:$0xff]  }
  0x8b   :  { %990 = vmatprep.subr.bf16.mxu0 %v1535_v29  ;;  %v1609_v29 = vld [vmem:[#allocation7 + $0x30] sm:$0xff]  }
  0x8d   :  { %909 = vmatpush1.bf16.msra.mxu1 %v1530_v30  ;;  %v1610_v30 = vld [vmem:[#allocation7 + $0x78] sm:$0xff]  }
  0x8e   :  { %991 = vmatpush1.bf16.msra.mxu0 %v1533_v31  ;;  %910 = vmatprep.subr.bf16.mxu1 %v1538_v32  ;;  %v1611_v31 = vld [vmem:[#allocation7 + $0x38] sm:$0xff]   ;;  %v207_v32 = vlaneseq }
  0x8f   :  { %992 = vmatprep.subr.bf16.mxu0 %v1541_v33 }
  0x90   :  { %v208_v33 = vshrl.u32 %v207_v32, 7 }
  0x91   :  { %911 = vmatpush1.bf16.msra.mxu1 %v1536_v35  ;;  %v205_v35 = vld [vmem:[%s1800_s2] sm:$0x3] }
  0x92   :  { %993 = vmatpush1.bf16.msra.mxu0 %v1539_v36  ;;  %912 = vmatprep.subr.bf16.mxu1 %v1544_v39  ;;  %v209_v34 = vsub.s32 0, %v208_v33  ;;  %v213_v36 = vsub.s32 1, %v208_v33 }
  0x93   :  { %994 = vmatprep.subr.bf16.mxu0 %v1547_v41 }
  0x94   :  { %v210_v37 = vrot.slane %v205_v35, %v209_v34  ;;  %v214_v38 = vrot.slane %v205_v35, %v213_v36 }
  0x95   :  { %913 = vmatpush1.bf16.msra.mxu1 %v1542_v42 }
  0x96   :  { %995 = vmatpush1.bf16.msra.mxu0 %v1545_v43  ;;  %914 = vmatprep.subr.bf16.mxu1 %v1550_v44 }
  0x97   :  { %996 = vmatprep.subr.bf16.mxu0 %v1553_v45 }
  0x99   :  { %915 = vmatpush1.bf16.msra.mxu1 %v1548_v46 }
  0x9a   :  { %997 = vmatpush1.bf16.msra.mxu0 %v1551_v47  ;;  %916 = vmatprep.subr.bf16.mxu1 %v1556_v48 }
  0x9b   :  { %998 = vmatprep.subr.bf16.mxu0 %v1559_v49 }
  0x9d   :  { %917 = vmatpush1.bf16.msra.mxu1 %v1554_v50 }
  0x9e   :  { %999 = vmatpush1.bf16.msra.mxu0 %v1557_v51  ;;  %918 = vmatprep.subr.bf16.mxu1 %v1562_v52 }
  0x9f   :  { %1000 = vmatprep.subr.bf16.mxu0 %v1565_v53 }
  0xa1   :  { %919 = vmatpush1.bf16.msra.mxu1 %v1560_v54 }
  0xa2   :  { %1001 = vmatpush1.bf16.msra.mxu0 %v1563_v55  ;;  %920 = vmatprep.subr.bf16.mxu1 %v1568_v56  ;;  %v1345_v56 = vld [vmem:[%s1802_s4] ss:$0 sm:$0xff] }
  0xa3   :  { %1002 = vmatprep.subr.bf16.mxu0 %v1571_v57 }
  0xa5   :  { %921 = vmatpush1.bf16.msra.mxu1 %v1566_v58 }
  0xa6   :  { %1003 = vmatpush1.bf16.msra.mxu0 %v1569_v59  ;;  %922 = vmatprep.subr.bf16.mxu1 %v1574_v60 }
  0xa7   :  { %1004 = vmatprep.subr.bf16.mxu0 %v1577_v61 }
  0xa9   :  { %923 = vmatpush1.bf16.msra.mxu1 %v1572_v62 }
  0xaa   :  { %1005 = vmatpush1.bf16.msra.mxu0 %v1575_v63  ;;  %924 = vmatprep.subr.bf16.mxu1 %v1580_v0 }
  0xab   :  { %1006 = vmatprep.subr.bf16.mxu0 %v1583_v1 }
  0xad   :  { %925 = vmatpush1.bf16.msra.mxu1 %v1578_v2 }
  0xae   :  { %1007 = vmatpush1.bf16.msra.mxu0 %v1581_v3  ;;  %926 = vmatprep.subr.bf16.mxu1 %v1586_v4 }
  0xaf   :  { %1008 = vmatprep.subr.bf16.mxu0 %v1589_v5 }
  0xb1   :  { %927 = vmatpush1.bf16.msra.mxu1 %v1584_v6 }
  0xb2   :  { %1009 = vmatpush1.bf16.msra.mxu0 %v1587_v7  ;;  %928 = vmatprep.subr.bf16.mxu1 %v1592_v8 }
  0xb3   :  { %1010 = vmatprep.subr.bf16.mxu0 %v1595_v9 }
  0xb5   :  { %929 = vmatpush1.bf16.msra.mxu1 %v1590_v10 }
  0xb6   :  { %1011 = vmatpush1.bf16.msra.mxu0 %v1593_v11  ;;  %1362 = vmatprep.subr.bf16.mxu1 %v1596_v14 }
  0xb8   :  { %931 = vmatmul.mubr.bf16.vlgmr.msra.gmra.mrb[0].mxu1 %v71_v15 }
  0xb9   :  { %1013 = vmatmul.mubr.bf16.vlgmr.msra.gmra.mrb[0].mxu0 %v75_v16  ;;  %1363 = vmatpush3.bf16.msra.mxu1 %v1597_v17 }
  0xba   :  { %1364 = vmatprep.subr.bf16.mxu1 %v1598_v18 }
  0xbd   :  { %1365 = vmatpush3.bf16.msra.mxu1 %v1599_v19 }
  0xbe   :  { %1366 = vmatprep.subr.bf16.mxu1 %v1600_v20 }
  0xc1   :  { %1367 = vmatpush3.bf16.msra.mxu1 %v1601_v21 }
  0xc2   :  { %1368 = vmatprep.subr.bf16.mxu1 %v1602_v22 }
  0xc5   :  { %1369 = vmatpush3.bf16.msra.mxu1 %v1603_v23 }
  0xc6   :  { %1370 = vmatprep.subr.bf16.mxu1 %v1604_v24 }
  0xc9   :  { %1371 = vmatpush3.bf16.msra.mxu1 %v1605_v25 }
  0xca   :  { %1372 = vmatprep.subr.bf16.mxu1 %v1606_v26 }
  0xcd   :  { %1373 = vmatpush3.bf16.msra.mxu1 %v1607_v27 }
  0xce   :  { %1374 = vmatprep.subr.bf16.mxu1 %v1608_v28 }
  0xd1   :  { %1375 = vmatpush3.bf16.msra.mxu1 %v1609_v29 }
  0xd2   :  { %1376 = vmatprep.subr.bf16.mxu1 %v1610_v30 }
  0xd5   :  { %1377 = vmatpush3.bf16.msra.mxu1 %v1611_v31 }
 0x18b   :  { %v932_v39 = vpop.f32.mrb[0].mxu1 }
 0x18c   :  { %v1014_v40 = vpop.f32.mrb[0].mxu0  ;;  %v1384_v41 = vadd.f32 %v932_v39, %v210_v37  ;;  %v934_v42 = vpop.f32.mrb[1].mxu1 }
 0x18d   :  { %v1016_v43 = vpop.f32.mrb[1].mxu0  ;;  %v1386_v44 = vadd.f32 %v934_v42, %v214_v38  ;;  %v936_v45 = vpop.f32.mrb[2].mxu1 }
 0x18e   :  { %v1018_v46 = vpop.f32.mrb[2].mxu0  ;;  %v1385_v47 = vadd.f32 %v1384_v41, %v1014_v40  ;;  %v937_v48 = vpop.f32.mrb[3].mxu1 }
 0x18f   :  { %v1019_v49 = vpop.f32.mrb[3].mxu0  ;;  %v1387_v50 = vadd.f32 %v1386_v44, %v1016_v43 }
 0x190   :  { %v1021_v51 = vmax.f32 %v1385_v47, 0.0 }
 0x191   :  { %v1022_v52 = vmax.f32 %v1387_v50, 0.0 }
 0x192   :  { %v1023_v54 = vpack.c.bf16 %v1021_v51, %v1021_v51 }
 0x193   :  { %v1024_v53 = vpack.c.bf16 %v1022_v52, %v1022_v52 }
 0x195   :  { %1192 = vmatprep.mubr.bf16.mxu1 %v1024_v53 }
 0x196   :  { %1193 = vmatmul.mubr.bf16.vlgmr.msra.gmra.mrb[4].mxu1 %v1023_v54 }
 0x269   :  { %v1378_v55 = vpop.f32.mrb[4].mxu1 }
 0x26a   :  { %v1379_v57 = vpop.f32.mrb[5].mxu1 }
 0x26b   :  { %v1380_v58 = vadd.f32 %v1379_v57, %v1378_v55  ;;  %v1381_v59 = vpop.f32.mrb[6].mxu1 }
 0x26c   :  { %v1382_v60 = vpop.f32.mrb[7].mxu1 }
 0x26d   :  { %v1195_v61 = vadd.f32 %v1380_v58, %v1345_v56 }
 0x26f   :  { %1200 = vst [vmem:[#allocation8] sm:$0xff] %v1195_v61 }
 0x270   :  { %1689 = shalt.err (!%p1686_p0)
}
 0x271   :  { %s1690_s4 = scalar_lea.hbm %s1803_s5, 128 }
 0x272   :  { %p1691_p1 = scmp.ne.s32.totalorder %s1803_s5, %s1690_s4  ;;  %p1694_p2 = scmp.lt.u32.totalorder %s1690_s4, %s1803_s5 }
 0x274   :  { %p1696_p3 = pnand %p1694_p2, %p1691_p1 }
 0x276   :  { %1699 = shalt.err (!%p1696_p3)
}
 0x277   :  { %1210 = dma.vmem_to_hbm [thread:$0]  %s1208_s9, 128, %s1803_s5, [#allocation4]  }
 0x278   :  { %1704 = dma.done.wait [#allocation4], 128  }
 0x279   :  { %1705 = vsyncadd [#allocation4], 4294967168 }
 0x27a   :  { %1214 = vsyncpa [#allocation3], 1 }
 0x27b   :  { %1215 = vsyncpa [#allocation6], 1 }
 0x27c   :  { %1216 = vsyncpa [#allocation4], 1 }

</bundles_post_ra>
